<compile_context>
chip_gen: v7x
topology: tpu7x:2x2x1
jax: 0.10.0
libtpu: 0.0.40
codegen_flags: <defaults>
</compile_context>

<pallas_src>
import functools

import jax
import jax.numpy as jnp
from jax.experimental import pallas as pl
from jax.experimental.pallas import tpu as pltpu


# ---------------------------------------------------------------------------
# In-kernel helpers
# ---------------------------------------------------------------------------
def _gelu(x):
    # 0.5*x*(1+tanh(sqrt(2/pi)*(x+0.044715*x^3))); x*x*x avoids integer_pow.
    c = 0.7978845608028654  # sqrt(2/pi)
    return 0.5 * x * (1.0 + jnp.tanh(c * (x + 0.044715 * (x * x * x))))


def _hidden(x_ref, w1_ref, b1_ref, w2_dtype, f32_elem):
    """GELU(x @ w1 + b1), MXU-accumulated in f32, elementwise in f32 or bf16."""
    h = jnp.dot(x_ref[...], w1_ref[...], preferred_element_type=jnp.float32)
    h = h + b1_ref[...].astype(jnp.float32)
    if f32_elem:
        return _gelu(h).astype(w2_dtype)        # v5e path: f32 VPU/EUP
    return _gelu(h.astype(w2_dtype))            # v6e/v7x: bf16 VPU/EUP


# ---------------------------------------------------------------------------
# Kernel A: weights fully resident in VMEM, 1-D grid over token tiles.
# ---------------------------------------------------------------------------
def _ffn_resident_kernel(x_ref, w1_ref, b1_ref, w2_ref, b2_ref, out_ref, *,
                         f32_elem):
    h = _hidden(x_ref, w1_ref, b1_ref, w2_ref.dtype, f32_elem)
    y = jnp.dot(h, w2_ref[...], preferred_element_type=jnp.float32)
    out_ref[...] = (y + b2_ref[...].astype(jnp.float32)).astype(out_ref.dtype)


# ---------------------------------------------------------------------------
# Kernel B: hidden dim tiled as a reduction axis into an f32 VMEM accumulator.
# grid = (M // tm, H // tn); output written once on the last hidden tile.
# ---------------------------------------------------------------------------
def _ffn_tiled_kernel(x_ref, w1_ref, b1_ref, w2_ref, b2_ref, out_ref, acc_ref, *,
                      f32_elem):
    n = pl.program_id(1)

    @pl.when(n == 0)
    def _():
        acc_ref[...] = jnp.zeros_like(acc_ref)

    h = _hidden(x_ref, w1_ref, b1_ref, w2_ref.dtype, f32_elem)
    acc_ref[...] += jnp.dot(h, w2_ref[...], preferred_element_type=jnp.float32)

    @pl.when(n == pl.num_programs(1) - 1)
    def _():
        out_ref[...] = (acc_ref[...] + b2_ref[...].astype(jnp.float32)
                        ).astype(out_ref.dtype)


# ---------------------------------------------------------------------------
# Wrapper helpers
# ---------------------------------------------------------------------------
def _round_up(x, m):
    return (x + m - 1) // m * m


def _largest_div_tile(total, target, mult):
    """Largest multiple of `mult` that divides `total` and is <= target."""
    best = mult
    for t in range(mult, total + 1, mult):
        if total % t == 0:
            if t <= target:
                best = t
            else:
                break
    return best


def _tpu_generation_info():
    """(physical VMEM bytes, has >=2 TensorCores, has bf16 VPU/EUP)."""
    phys_vmem = 128 * 1024 * 1024
    multicore = False
    bf16_vpu = True
    try:
        kind = jax.devices()[0].device_kind.lower()
    except Exception:
        kind = ""
    if "v7" in kind:
        phys_vmem = 64 * 1024 * 1024
        multicore = True
    elif "v4" in kind or "v5p" in kind:
        multicore = True
    if ("v5" in kind and "v5p" not in kind) or "v4" in kind or "v3" in kind \
            or "v2" in kind:
        bf16_vpu = False            # v5e & older: keep elementwise math in f32
    try:
        info = pltpu.get_tpu_info()
        phys_vmem = int(getattr(info, "vmem_capacity_bytes", phys_vmem)) or phys_vmem
    except Exception:
        pass
    return phys_vmem, multicore, bf16_vpu


# ---------------------------------------------------------------------------
# Public entry: y = GELU(x @ w1 + b1) @ w2 + b2, w1:(E,4E), w2:(4E,E).
# ---------------------------------------------------------------------------
def feed_forward(x, w1, b1, w2, b2, *, compute_dtype=jnp.bfloat16,
                 tile_m=None, tile_n=None, force_tiled=False):
    orig_shape = x.shape
    orig_dtype = x.dtype
    E = orig_shape[-1]
    H = w1.shape[1]
    assert w1.shape == (E, H) and w2.shape == (H, E)
    assert b1.shape == (H,) and b2.shape == (E,)

    # --- pad E / H once to lane multiples (128): lane-dense loads & stores ----
    Ep = _round_up(E, 128)
    Hp = _round_up(H, 128)
    if Ep != E:
        x = jnp.pad(x, [(0, 0)] * (x.ndim - 1) + [(0, Ep - E)])
        w1 = jnp.pad(w1, ((0, Ep - E), (0, 0)))
        w2 = jnp.pad(w2, ((0, 0), (0, Ep - E)))
        b2 = jnp.pad(b2, (0, Ep - E))
    if Hp != H:
        w1 = jnp.pad(w1, ((0, 0), (0, Hp - H)))
        b1 = jnp.pad(b1, (0, Hp - H))
        w2 = jnp.pad(w2, ((0, Hp - H), (0, 0)))

    # --- bf16 matmul operands by default (f32 accumulation preserved) --------
    if compute_dtype is not None:
        x = x.astype(compute_dtype)
        w1 = w1.astype(compute_dtype)
        w2 = w2.astype(compute_dtype)

    x2 = x.reshape(-1, Ep)
    M = x2.shape[0]
    csz = jnp.dtype(x2.dtype).itemsize
    osz = jnp.dtype(orig_dtype).itemsize

    phys_vmem, multicore, bf16_vpu = _tpu_generation_info()
    vmem_cap = int(phys_vmem * 0.75)            # ~96 MiB (128-MiB chips), ~48 MiB (v7x)
    f32_elem = (csz >= 4) or (not bf16_vpu)     # bf16 GELU only where VPU/EUP do bf16

    sub = 8 if csz >= 4 else (16 if csz == 2 else 32)   # sublane minimum per dtype
    big_vmem = vmem_cap >= 80 * 1024 * 1024
    tm_target = tile_m if tile_m is not None else (512 if big_vmem else 256)
    tn_target = tile_n if tile_n is not None else (1024 if big_vmem else 512)

    # --- token tile -----------------------------------------------------------
    tm = min(tm_target, _round_up(M, sub))
    tm = max(sub, tm // sub * sub)
    # Only halve on chips that actually have 2 TensorCores; never below the
    # dtype sublane minimum (bf16 min tile is (16, 128)).
    if multicore and pl.cdiv(M, tm) < 2 and tm >= 2 * sub:
        tm = max(sub, (tm // 2) // sub * sub)

    bias_bytes = (Hp + Ep) * csz

    def resident_fp(tm_):
        return (2 * (2 * Ep * Hp * csz + bias_bytes)      # double-buffered weight blocks
                + 2 * tm_ * Ep * (csz + osz)              # x / out double-buffered
                + tm_ * Hp * 4 + tm_ * Ep * 4)            # h / y f32 intermediates

    def tiled_fp(tm_, tn_):
        return (2 * (tm_ * Ep * csz + Ep * tn_ * csz + tn_ * csz
                     + tn_ * Ep * csz + Ep * csz)         # double-buffered inputs
                + 2 * tm_ * Ep * osz                      # output
                + tm_ * Ep * 4 + tm_ * tn_ * 4)           # accumulator + h

    use_resident = (not force_tiled) and resident_fp(tm) <= int(0.8 * vmem_cap)

    grid_m = pl.cdiv(M, tm)                    # no jnp.pad of x2: partial last tile
    dsemantics_last = ()
    if use_resident:
        tn = Hp
        grid = (grid_m,)
        kernel = functools.partial(_ffn_resident_kernel, f32_elem=f32_elem)
        in_specs = [
            pl.BlockSpec((tm, Ep), lambda m: (m, 0)),     # x token tile
            pl.BlockSpec((Ep, Hp), lambda m: (0, 0)),     # w1 resident
            pl.BlockSpec((1, Hp), lambda m: (0, 0)),      # b1 resident
            pl.BlockSpec((Hp, Ep), lambda m: (0, 0)),     # w2 resident
            pl.BlockSpec((1, Ep), lambda m: (0, 0)),      # b2 resident
        ]
        out_specs = pl.BlockSpec((tm, Ep), lambda m: (m, 0))
        scratch_shapes = []
        dims = ("parallel",)
    else:
        tn = _largest_div_tile(Hp, tn_target, 128)
        while tiled_fp(tm, tn) > int(0.9 * vmem_cap):
            if tn > 128:
                tn = _largest_div_tile(Hp, max(128, tn // 2), 128)
            elif tm > sub:
                tm = max(sub, (tm // 2) // sub * sub)
            else:
                break
        grid_m = pl.cdiv(M, tm)
        grid = (grid_m, Hp // tn)
        kernel = functools.partial(_ffn_tiled_kernel, f32_elem=f32_elem)
        in_specs = [
            pl.BlockSpec((tm, Ep), lambda m, n: (m, 0)),  # x token tile
            pl.BlockSpec((Ep, tn), lambda m, n: (0, n)),  # w1 hidden tile
            pl.BlockSpec((1, tn), lambda m, n: (0, n)),   # b1 hidden tile
            pl.BlockSpec((tn, Ep), lambda m, n: (n, 0)),  # w2 hidden tile
            pl.BlockSpec((1, Ep), lambda m, n: (0, 0)),   # b2 constant
        ]
        out_specs = pl.BlockSpec((tm, Ep), lambda m, n: (m, 0))
        scratch_shapes = [pltpu.VMEM((tm, Ep), jnp.float32)]
        dims = ("parallel", "arbitrary")

    weight_stream = (1 if use_resident else grid_m) * 2 * Ep * Hp * csz
    cost = pl.CostEstimate(
        flops=4 * M * Ep * Hp,                 # two matmuls, 2 flops/MAC
        transcendentals=M * Hp,                # tanh in GELU
        bytes_accessed=int(M * Ep * (csz + osz) + weight_stream + bias_bytes),
    )

    out = pl.pallas_call(
        kernel,
        out_shape=jax.ShapeDtypeStruct((M, Ep), orig_dtype),
        grid=grid,
        in_specs=in_specs,
        out_specs=out_specs,
        scratch_shapes=scratch_shapes,
        compiler_params=pltpu.CompilerParams(
            dimension_semantics=dims,
            vmem_limit_bytes=vmem_cap),
        cost_estimate=cost,
    )(x2, w1, b1.reshape(1, Hp), w2, b2.reshape(1, Ep))

    if Ep != E:
        out = out[:, :E]
    return out.reshape(orig_shape)


# ---------------------------------------------------------------------------
if __name__ == "__main__":
    E = 32               # cfg['emb_dim']
    H = 4 * E
    B, T = 2, 8

    key = jax.random.PRNGKey(0)
    kx, k1, k2, kb1, kb2 = jax.random.split(key, 5)

    # nn.Linear stores weight as (out, in); pre-transpose to (in, out).
    w1_t = jax.random.normal(k1, (H, E), jnp.float32) * 0.02
    w2_t = jax.random.normal(k2, (E, H), jnp.float32) * 0.02
    b1 = jax.random.normal(kb1, (H,), jnp.float32) * 0.02
    b2 = jax.random.normal(kb2, (E,), jnp.float32) * 0.02
    w1 = w1_t.T          # (E, H)
    w2 = w2_t.T          # (H, E)

    x = jax.random.normal(kx, (B, T, E), jnp.float32)

    # pure-JAX reference (same tanh-GELU as the PyTorch module)
    def ref(xv):
        h = jnp.dot(xv, w1, preferred_element_type=jnp.float32,
                    precision=jax.lax.Precision.HIGHEST) + b1
        h = 0.5 * h * (1.0 + jnp.tanh(jnp.sqrt(2.0 / jnp.pi)
                                      * (h + 0.044715 * h ** 3)))
        return jnp.dot(h, w2, preferred_element_type=jnp.float32,
                       precision=jax.lax.Precision.HIGHEST) + b2

    y_ref = ref(x)

    # Default path: bf16 matmul operands, f32 accumulation (weights resident).
    y = feed_forward(x, w1, b1, w2, b2)
    jax.block_until_ready(y)
    assert y.shape == (B, T, E)
    assert bool(jnp.all(jnp.isfinite(y)))
    assert bool(jnp.allclose(y, y_ref, rtol=2e-2, atol=2e-2)), \
        float(jnp.max(jnp.abs(y - y_ref)))

    # f32 parity path.
    y32 = feed_forward(x, w1, b1, w2, b2, compute_dtype=None)
    jax.block_until_ready(y32)
    assert bool(jnp.all(jnp.isfinite(y32)))
    assert bool(jnp.allclose(y32, y_ref, rtol=1e-3, atol=1e-4)), \
        float(jnp.max(jnp.abs(y32 - y_ref)))

    # Hidden-dim-tiled (accumulator) path, forced at small shape for coverage.
    y_tiled = feed_forward(x, w1, b1, w2, b2, force_tiled=True)
    jax.block_until_ready(y_tiled)
    assert bool(jnp.all(jnp.isfinite(y_tiled)))
    assert bool(jnp.allclose(y_tiled, y_ref, rtol=2e-2, atol=2e-2)), \
        float(jnp.max(jnp.abs(y_tiled - y_ref)))

    print("KERNEL_OK")
</pallas_src>

<mosaic_0001>
module attributes {stable_mosaic.version = 11 : i64} {
  func.func @_ffn_resident_kernel(%arg0: i32, %arg1: memref<16x128xbf16, #tpu.memory_space<vmem>>, %arg2: memref<128x128xbf16, #tpu.memory_space<vmem>>, %arg3: memref<1x128xf32, #tpu.memory_space<vmem>>, %arg4: memref<128x128xbf16, #tpu.memory_space<vmem>>, %arg5: memref<1x128xf32, #tpu.memory_space<vmem>>, %arg6: memref<16x128xf32, #tpu.memory_space<vmem>>) attributes {dimension_semantics = [#tpu.dimension_semantics<parallel>], iteration_bounds = array<i64: 1>, scalar_prefetch = 0 : i64, scratch_operands = 0 : i64, tpu.core_type = #tpu.core_type<tc>, window_params = [{transform_indices = @transform_0, window_bounds = array<i64: 16, 128>}, {pipeline_mode = #tpu.pipeline_mode<synchronous>, transform_indices = @transform_1, window_bounds = array<i64: 128, 128>}, {pipeline_mode = #tpu.pipeline_mode<synchronous>, transform_indices = @transform_2, window_bounds = array<i64: 1, 128>}, {pipeline_mode = #tpu.pipeline_mode<synchronous>, transform_indices = @transform_3, window_bounds = array<i64: 128, 128>}, {pipeline_mode = #tpu.pipeline_mode<synchronous>, transform_indices = @transform_4, window_bounds = array<i64: 1, 128>}, {transform_indices = @transform_5, window_bounds = array<i64: 16, 128>}]} {
    %c0 = arith.constant 0 : index
    %c0_0 = arith.constant 0 : index
    %0 = vector.load %arg1[%c0, %c0_0] : memref<16x128xbf16, #tpu.memory_space<vmem>>, vector<16x128xbf16>
    %c0_1 = arith.constant 0 : index
    %c0_2 = arith.constant 0 : index
    %1 = vector.load %arg2[%c0_1, %c0_2] : memref<128x128xbf16, #tpu.memory_space<vmem>>, vector<128x128xbf16>
    %cst = arith.constant dense<0.000000e+00> : vector<16x128xf32>
    %2 = tpu.matmul %0, %1, %cst {dimension_numbers = #tpu.dot_dimension_numbers<[1], [0], [0], [1], [0, 0, 1, 1], [], []>} : vector<16x128xbf16>, vector<128x128xbf16>, vector<16x128xf32> -> vector<16x128xf32>
    %c0_3 = arith.constant 0 : index
    %c0_4 = arith.constant 0 : index
    %3 = vector.load %arg3[%c0_3, %c0_4] : memref<1x128xf32, #tpu.memory_space<vmem>>, vector<1x128xf32>
    %4 = vector.broadcast %3 : vector<1x128xf32> to vector<16x128xf32>
    %5 = arith.addf %2, %4 : vector<16x128xf32>
    %6 = arith.truncf %5 : vector<16x128xf32> to vector<16x128xbf16>
    %cst_5 = arith.constant 5.000000e-01 : bf16
    %7 = vector.broadcast %cst_5 : bf16 to vector<16x128xbf16>
    %8 = arith.mulf %7, %6 : vector<16x128xbf16>
    %9 = arith.mulf %6, %6 : vector<16x128xbf16>
    %10 = arith.mulf %9, %6 : vector<16x128xbf16>
    %cst_6 = arith.constant 4.467770e-02 : bf16
    %11 = vector.broadcast %cst_6 : bf16 to vector<16x128xbf16>
    %12 = arith.mulf %11, %10 : vector<16x128xbf16>
    %13 = arith.addf %6, %12 : vector<16x128xbf16>
    %cst_7 = arith.constant 7.968750e-01 : bf16
    %14 = vector.broadcast %cst_7 : bf16 to vector<16x128xbf16>
    %15 = arith.mulf %14, %13 : vector<16x128xbf16>
    %16 = math.tanh %15 : vector<16x128xbf16>
    %cst_8 = arith.constant 1.000000e+00 : bf16
    %17 = vector.broadcast %cst_8 : bf16 to vector<16x128xbf16>
    %18 = arith.addf %17, %16 : vector<16x128xbf16>
    %19 = arith.mulf %8, %18 : vector<16x128xbf16>
    %c0_9 = arith.constant 0 : index
    %c0_10 = arith.constant 0 : index
    %20 = vector.load %arg4[%c0_9, %c0_10] : memref<128x128xbf16, #tpu.memory_space<vmem>>, vector<128x128xbf16>
    %cst_11 = arith.constant dense<0.000000e+00> : vector<16x128xf32>
    %21 = tpu.matmul %19, %20, %cst_11 {dimension_numbers = #tpu.dot_dimension_numbers<[1], [0], [0], [1], [0, 0, 1, 1], [], []>} : vector<16x128xbf16>, vector<128x128xbf16>, vector<16x128xf32> -> vector<16x128xf32>
    %c0_12 = arith.constant 0 : index
    %c0_13 = arith.constant 0 : index
    %22 = vector.load %arg5[%c0_12, %c0_13] : memref<1x128xf32, #tpu.memory_space<vmem>>, vector<1x128xf32>
    %23 = vector.broadcast %22 : vector<1x128xf32> to vector<16x128xf32>
    %24 = arith.addf %21, %23 : vector<16x128xf32>
    %c0_14 = arith.constant 0 : index
    %c0_15 = arith.constant 0 : index
    %25 = vector.load %arg6[%c0_14, %c0_15] : memref<16x128xf32, #tpu.memory_space<vmem>>, vector<16x128xf32>
    tpu.vector_store %arg6[%c0_14, %c0_15], %24 {strides = array<i32>} : memref<16x128xf32, #tpu.memory_space<vmem>>, vector<16x128xf32>,
    return
  }
  func.func @transform_0(%arg0: i32) -> (i32, i32) {
    %c0_i32 = arith.constant 0 : i32
    %c0_i32_0 = arith.constant 0 : i32
    return %arg0, %c0_i32 : i32, i32
  }
  func.func @transform_1(%arg0: i32) -> (i32, i32) {
    %c0_i32 = arith.constant 0 : i32
    %c0_i32_0 = arith.constant 0 : i32
    %c0_i32_1 = arith.constant 0 : i32
    return %c0_i32, %c0_i32_0 : i32, i32
  }
  func.func @transform_2(%arg0: i32) -> (i32, i32) {
    %c0_i32 = arith.constant 0 : i32
    %c0_i32_0 = arith.constant 0 : i32
    %c0_i32_1 = arith.constant 0 : i32
    return %c0_i32, %c0_i32_0 : i32, i32
  }
  func.func @transform_3(%arg0: i32) -> (i32, i32) {
    %c0_i32 = arith.constant 0 : i32
    %c0_i32_0 = arith.constant 0 : i32
    %c0_i32_1 = arith.constant 0 : i32
    return %c0_i32, %c0_i32_0 : i32, i32
  }
  func.func @transform_4(%arg0: i32) -> (i32, i32) {
    %c0_i32 = arith.constant 0 : i32
    %c0_i32_0 = arith.constant 0 : i32
    %c0_i32_1 = arith.constant 0 : i32
    return %c0_i32, %c0_i32_0 : i32, i32
  }
  func.func @transform_5(%arg0: i32) -> (i32, i32) {
    %c0_i32 = arith.constant 0 : i32
    %c0_i32_0 = arith.constant 0 : i32
    return %arg0, %c0_i32 : i32, i32
  }
}

</mosaic_0001>

<bundles_post_ra>
// kernel: tpu_custom_call.1
= control target key start
LH: loop header
LB: loop body
LE: loop exit
PB: predicated region body
PF: predicated region fallthrough
CT: control target
= control target key end

     0   :  { %10 = vsyncpa [#allocation3], 0  ;;  %s731_s0 = inlined_call_operand.hbm [shape: bf16[16,128], index: 0, kind: input, shape index: {}]   ;;  %s732_s1 = inlined_call_operand.hbm [shape: bf16[128,128], index: 1, kind: input, shape index: {}]   ;;  %s733_s2 = inlined_call_operand.hbm [shape: f32[1,128], index: 2, kind: input, shape index: {}]   ;;  %s734_s3 = inlined_call_operand.hbm [shape: bf16[128,128], index: 3, kind: input, shape index: {}]   ;;  %s735_s4 = inlined_call_operand.hbm [shape: f32[1,128], index: 4, kind: input, shape index: {}]   ;;  %s736_s5 = inlined_call_operand.hbm [shape: f32[16,128], index: 5, kind: output, shape index: {}]  }
   0x1   :  { %11 = vsyncpa [#allocation6], 0 }
   0x2   :  { %12 = vsyncpa [#allocation9], 0 }
   0x3   :  { %13 = vsyncpa [#allocation4], 0  ;;  %s601_s18 = smov [#allocation5]   ;;  %s602_s20 = smov [#allocation8]  }
   0x4   :  { %s31_s19 = sshll.u32 %s601_s18, 4  ;;  %s53_s21 = sshll.u32 %s602_s20, 4  ;;  %s32_s19 = int_to_ptr.vmem [resolvable:$true] %s31_s19  ;;  %s643_s21 = int_to_ptr.vmem [resolvable:$true] %s53_s21 }
   0x5   :  { %s461_s24 = scalar_lea.hbm %s732_s1, 1024 }
   0x6   :  { %p462_p0 = scmp.ne.s32.totalorder %s732_s1, %s461_s24  ;;  %p465_p1 = scmp.lt.u32.totalorder %s461_s24, %s732_s1 }
   0x8   :  { %p467_p2 = pnand %p465_p1, %p462_p0 }
   0xa   :  { %470 = shalt.err (!%p467_p2)
}
   0xb   :  { %s471_s29 = scalar_lea.vmem %s32_s19, 1024  ;;  %p476_p4 = scmp.lt.s32.totalorder %s32_s19, %s32_s19 }
   0xc   :  { %p472_p3 = scmp.ne.s32.totalorder %s32_s19, %s471_s29  ;;  %p477_p5 = scmp.lt.s32.totalorder %s471_s29, %s471_s29 }
   0xe   :  { %p478_p6 = por %p477_p5, %p476_p4 }
  0x10   :  { %p479_p7 = pnand %p478_p6, %p472_p3 }
  0x12   :  { %482 = shalt.err (!%p479_p7)
}
  0x13   :  { %s603_s30 = smov 64   ;;  %s604_s6 = smov 4  }
  0x14   :  { %37 = dma.hbm_to_vmem [thread:$0]  %s732_s1, 1024, %s32_s19, [#allocation6], %s603_s30, %s603_s30, %s604_s6  }
  0x15   :  { %s483_s11 = scalar_lea.hbm %s734_s3, 1024 }
  0x16   :  { %p484_p8 = scmp.ne.s32.totalorder %s734_s3, %s483_s11  ;;  %p487_p9 = scmp.lt.u32.totalorder %s483_s11, %s734_s3 }
  0x18   :  { %p489_p10 = pnand %p487_p9, %p484_p8 }
  0x1a   :  { %492 = shalt.err (!%p489_p10)
}
  0x1b   :  { %s493_s16 = scalar_lea.vmem %s643_s21, 1024  ;;  %p498_p12 = scmp.lt.s32.totalorder %s643_s21, %s643_s21 }
  0x1c   :  { %p494_p11 = scmp.ne.s32.totalorder %s643_s21, %s493_s16  ;;  %p499_p13 = scmp.lt.s32.totalorder %s493_s16, %s493_s16 }
  0x1e   :  { %p500_p0 = por %p499_p13, %p498_p12 }
  0x20   :  { %p501_p1 = pnand %p500_p0, %p494_p11 }
  0x22   :  { %504 = shalt.err (!%p501_p1)
}
  0x23   :  { %59 = dma.hbm_to_vmem [thread:$0]  %s734_s3, 1024, %s643_s21, [#allocation9], %s603_s30, %s603_s30, %s604_s6  }
  0x24   :  { %s605_s18 = smov [#allocation2]   ;;  %s606_s20 = smov [#allocation7]  }
  0x25   :  { %s19_s19 = sshll.u32 %s605_s18, 4  ;;  %s44_s22 = sshll.u32 %s606_s20, 4  ;;  %s20_s19 = int_to_ptr.vmem [resolvable:$true] %s19_s19  ;;  %s45_s22 = int_to_ptr.vmem [resolvable:$true] %s44_s22 }
  0x26   :  { %s505_s25 = scalar_lea.hbm %s731_s0, 128 }
  0x27   :  { %p506_p2 = scmp.ne.s32.totalorder %s731_s0, %s505_s25  ;;  %p509_p3 = scmp.lt.u32.totalorder %s505_s25, %s731_s0 }
  0x29   :  { %p511_p4 = pnand %p509_p3, %p506_p2 }
  0x2b   :  { %514 = shalt.err (!%p511_p4)
}
  0x2c   :  { %s515_s3 = scalar_lea.vmem %s20_s19, 128  ;;  %p520_p6 = scmp.lt.s32.totalorder %s20_s19, %s20_s19 }
  0x2d   :  { %p516_p5 = scmp.ne.s32.totalorder %s20_s19, %s515_s3  ;;  %p521_p7 = scmp.lt.s32.totalorder %s515_s3, %s515_s3 }
  0x2f   :  { %p522_p8 = por %p521_p7, %p520_p6 }
  0x31   :  { %p523_p9 = pnand %p522_p8, %p516_p5 }
  0x33   :  { %526 = shalt.err (!%p523_p9)
}
  0x34   :  { %25 = dma.hbm_to_vmem [thread:$0]  %s731_s0, 128, %s20_s19, [#allocation3], %s603_s30, %s603_s30, %s604_s6  }
  0x35   :  { %s527_s10 = scalar_lea.hbm %s733_s2, 16 }
  0x36   :  { %p528_p10 = scmp.ne.s32.totalorder %s733_s2, %s527_s10  ;;  %p531_p11 = scmp.lt.u32.totalorder %s527_s10, %s733_s2 }
  0x38   :  { %p533_p12 = pnand %p531_p11, %p528_p10 }
  0x3a   :  { %536 = shalt.err (!%p533_p12)
}
  0x3b   :  { %s537_s15 = scalar_lea.vmem %s45_s22, 16  ;;  %s541_s16 = scalar_lea.vmem %s45_s22, 32 }
  0x3c   :  { %p538_p13 = scmp.ne.s32.totalorder %s45_s22, %s537_s15  ;;  %p542_p0 = scmp.lt.s32.totalorder %s45_s22, %s45_s22 }
  0x3d   :  { %p543_p1 = scmp.lt.s32.totalorder %s541_s16, %s537_s15 }
  0x3f   :  { %p544_p2 = por %p543_p1, %p542_p0 }
  0x41   :  { %p545_p3 = pnand %p544_p2, %p538_p13 }
  0x43   :  { %548 = shalt.err (!%p545_p3)
}
  0x44   :  { %47 = dma.hbm_to_vmem [thread:$0]  %s733_s2, 16, %s45_s22, [#allocation6]  }
  0x45   :  { %s607_s6 = smov [#allocation10]   ;;  %s549_s19 = scalar_lea.hbm %s735_s4, 16 }
  0x46   :  { %s66_s1 = sshll.u32 %s607_s6, 4  ;;  %p550_p4 = scmp.ne.s32.totalorder %s735_s4, %s549_s19  ;;  %s67_s1 = int_to_ptr.vmem [resolvable:$true] %s66_s1 }
  0x47   :  { %p553_p5 = scmp.lt.u32.totalorder %s549_s19, %s735_s4 }
  0x49   :  { %p555_p6 = pnand %p553_p5, %p550_p4 }
  0x4b   :  { %558 = shalt.err (!%p555_p6)
}
  0x4c   :  { %s559_s26 = scalar_lea.vmem %s67_s1, 16  ;;  %s563_s2 = scalar_lea.vmem %s67_s1, 32 }
  0x4d   :  { %p560_p7 = scmp.ne.s32.totalorder %s67_s1, %s559_s26  ;;  %p564_p8 = scmp.lt.s32.totalorder %s67_s1, %s67_s1 }
  0x4e   :  { %p565_p9 = scmp.lt.s32.totalorder %s563_s2, %s559_s26 }
  0x50   :  { %p566_p10 = por %p565_p9, %p564_p8 }
  0x52   :  { %p567_p11 = pnand %p566_p10, %p560_p7 }
  0x54   :  { %570 = shalt.err (!%p567_p11)
}
  0x55   :  { %69 = dma.hbm_to_vmem [thread:$0]  %s735_s4, 16, %s67_s1, [#allocation9]  }
  0x56   :  { %593 = dma.done.wait [#allocation3], 128  }
  0x57   :  { %594 = vsyncadd [#allocation3], 4294967168 }
  0x58   :  { %595 = dma.done.wait [#allocation6], 1040  }
  0x59   :  { %596 = vsyncadd [#allocation6], 4294966256 }
  0x5a   :  { %597 = dma.done.wait [#allocation9], 1040  }
  0x5b   :  { %598 = vsyncadd [#allocation9], 4294966256  ;;  %v608_v0 = vmov 0.0   ;;  %vm609_vm0 = vmmov 0   ;;  %v442_v1 = vld [vmem:[#allocation5] sm:$0xff]   ;;  %v443_v2 = vld [vmem:[#allocation5 + $0x8] sm:$0xff]  }
  0x5c   :  { %390 = vmatprep.subr.bf16.mxu0 %v608_v0  ;;  %406 = vmatprep.mubr.msk.bf16.mxu0 %vm609_vm0, %v608_v0  ;;  %v444_v3 = vld [vmem:[#allocation5 + $0x10] sm:$0xff]   ;;  %v445_v4 = vld [vmem:[#allocation5 + $0x18] sm:$0xff]   ;;  %v446_v5 = vld [vmem:[#allocation5 + $0x20] sm:$0xff]   ;;  %s610_s4 = smov [#allocation11]  }
  0x5d   :  { %410 = vmatprep.subr.bf16.mxu1 %v608_v0  ;;  %426 = vmatprep.mubr.msk.bf16.mxu1 %vm609_vm0, %v608_v0  ;;  %v447_v6 = vld [vmem:[#allocation5 + $0x28] sm:$0xff]   ;;  %v448_v7 = vld [vmem:[#allocation5 + $0x30] sm:$0xff]   ;;  %v449_v8 = vld [vmem:[#allocation5 + $0x38] sm:$0xff]   ;;  %s339_s28 = sshll.u32 %s610_s4, 4  ;;  %s340_s28 = int_to_ptr.vmem [resolvable:$true] %s339_s28 }
  0x5e   :  { %391 = vmatpush3.bf16.msra.mxu0 %v442_v1  ;;  %v450_v9 = vld [vmem:[#allocation2] sm:$0xff]   ;;  %v451_v10 = vld [vmem:[#allocation8] sm:$0xff]   ;;  %v452_v11 = vld [vmem:[#allocation8 + $0x8] sm:$0xff]   ;;  %s571_s29 = scalar_lea.vmem %s340_s28, 256  ;;  %p576_p13 = scmp.lt.s32.totalorder %s340_s28, %s340_s28 }
  0x5f   :  { %392 = vmatprep.subr.bf16.mxu0 %v608_v0  ;;  %411 = vmatpush3.bf16.msra.mxu1 %v451_v10  ;;  %v453_v12 = vld [vmem:[#allocation8 + $0x10] sm:$0xff]   ;;  %v454_v13 = vld [vmem:[#allocation8 + $0x18] sm:$0xff]   ;;  %v455_v14 = vld [vmem:[#allocation8 + $0x20] sm:$0xff]   ;;  %p572_p12 = scmp.ne.s32.totalorder %s340_s28, %s571_s29  ;;  %p577_p0 = scmp.lt.s32.totalorder %s571_s29, %s571_s29 }
  0x60   :  { %412 = vmatprep.subr.bf16.mxu1 %v608_v0  ;;  %v456_v15 = vld [vmem:[#allocation8 + $0x28] sm:$0xff]   ;;  %v457_v16 = vld [vmem:[#allocation8 + $0x30] sm:$0xff]   ;;  %v458_v17 = vld [vmem:[#allocation8 + $0x38] sm:$0xff]  }
  0x61   :  { %v353_v18 = vld [vmem:[#allocation7] ss:$0 sm:$0xff]  ;;  %v363_v35 = vld [vmem:[#allocation10] ss:$0 sm:$0xff]  ;;  %p578_p1 = por %p577_p0, %p576_p13 }
  0x62   :  { %393 = vmatpush3.bf16.msra.mxu0 %v443_v2 }
  0x63   :  { %394 = vmatprep.subr.bf16.mxu0 %v608_v0  ;;  %413 = vmatpush3.bf16.msra.mxu1 %v452_v11  ;;  %p579_p2 = pnand %p578_p1, %p572_p12 }
  0x64   :  { %414 = vmatprep.subr.bf16.mxu1 %v608_v0 }
  0x66   :  { %395 = vmatpush3.bf16.msra.mxu0 %v444_v3 }
  0x67   :  { %396 = vmatprep.subr.bf16.mxu0 %v608_v0  ;;  %415 = vmatpush3.bf16.msra.mxu1 %v453_v12 }
  0x68   :  { %416 = vmatprep.subr.bf16.mxu1 %v608_v0 }
  0x6a   :  { %397 = vmatpush3.bf16.msra.mxu0 %v445_v4 }
  0x6b   :  { %398 = vmatprep.subr.bf16.mxu0 %v608_v0  ;;  %417 = vmatpush3.bf16.msra.mxu1 %v454_v13 }
  0x6c   :  { %418 = vmatprep.subr.bf16.mxu1 %v608_v0 }
  0x6e   :  { %399 = vmatpush3.bf16.msra.mxu0 %v446_v5 }
  0x6f   :  { %400 = vmatprep.subr.bf16.mxu0 %v608_v0  ;;  %419 = vmatpush3.bf16.msra.mxu1 %v455_v14 }
  0x70   :  { %420 = vmatprep.subr.bf16.mxu1 %v608_v0 }
  0x72   :  { %401 = vmatpush3.bf16.msra.mxu0 %v447_v6 }
  0x73   :  { %402 = vmatprep.subr.bf16.mxu0 %v608_v0  ;;  %421 = vmatpush3.bf16.msra.mxu1 %v456_v15 }
  0x74   :  { %422 = vmatprep.subr.bf16.mxu1 %v608_v0 }
  0x76   :  { %403 = vmatpush3.bf16.msra.mxu0 %v448_v7 }
  0x77   :  { %404 = vmatprep.subr.bf16.mxu0 %v608_v0  ;;  %423 = vmatpush3.bf16.msra.mxu1 %v457_v16 }
  0x78   :  { %424 = vmatprep.subr.bf16.mxu1 %v608_v0 }
  0x7a   :  { %405 = vmatpush3.bf16.msra.mxu0 %v449_v8 }
  0x7b   :  { %425 = vmatpush3.bf16.msra.mxu1 %v458_v17 }
  0x7d   :  { %407 = vmatmul.mubr.bf16.vlgmr.msra.gmra.mrb[0].mxu0 %v450_v9 }
 0x150   :  { %v203_v19 = vpop.f32.mrb[0].mxu0 }
 0x151   :  { %v408_v20 = vpop.f32.mrb[1].mxu0  ;;  %v204_v22 = vadd.f32 %v353_v18, %v203_v19 }
 0x152   :  { %v206_v21 = vpop.f32.mrb[2].mxu0 }
 0x153   :  { %v207_v23 = vadd.f32 %v353_v18, %v206_v21  ;;  %v409_v24 = vpop.f32.mrb[3].mxu0 }
 0x155   :  { %v210_v25 = vpack.c.bf16 %v207_v23, %v204_v22 }
 0x157   :  { %v212_v26 = vmul.bf16 %v210_v25, %v210_v25  ;;  %v211_v32 = vmul.bf16 1056980736, %v210_v25 }
 0x159   :  { %v213_v27 = vmul.bf16 %v212_v26, %v210_v25 }
 0x15b   :  { %v214_v28 = vmul.bf16 1027030327, %v213_v27 }
 0x15d   :  { %v215_v29 = vadd.bf16 %v214_v28, %v210_v25 }
 0x15f   :  { %v216_v30 = vmul.bf16 1061961548, %v215_v29 }
 0x161   :  { %459 = vtanh.bf16 %v216_v30 }
 0x16c   :  { %v460_v31 = vpop.eup %459 }
 0x16d   :  { %v218_v33 = vadd.bf16 1065369472, %v460_v31 }
 0x16f   :  { %v219_v34 = vmul.bf16 %v218_v33, %v211_v32 }
 0x171   :  { %427 = vmatmul.mubr.bf16.vlgmr.msra.gmra.mrb[0].mxu1 %v219_v34 }
 0x244   :  { %v325_v36 = vpop.f32.mrb[0].mxu1 }
 0x245   :  { %v326_v37 = vadd.f32 %v363_v35, %v325_v36  ;;  %v428_v38 = vpop.f32.mrb[1].mxu1 }
 0x246   :  { %v328_v39 = vpop.f32.mrb[2].mxu1 }
 0x247   :  { %332 = vst [vmem:[#allocation11] sm:$0xff] %v326_v37  ;;  %v329_v40 = vadd.f32 %v363_v35, %v328_v39  ;;  %v429_v41 = vpop.f32.mrb[3].mxu1 }
 0x249   :  { %333 = vst [vmem:[#allocation11 + $0x8] sm:$0xff] %v329_v40 }
 0x24a   :  { %582 = shalt.err (!%p579_p2)
}
 0x24b   :  { %s583_s7 = scalar_lea.hbm %s736_s5, 256 }
 0x24c   :  { %p584_p3 = scmp.ne.s32.totalorder %s736_s5, %s583_s7  ;;  %p587_p4 = scmp.lt.u32.totalorder %s583_s7, %s736_s5 }
 0x24e   :  { %p589_p5 = pnand %p587_p4, %p584_p3 }
 0x250   :  { %592 = shalt.err (!%p589_p5)
}
 0x251   :  { %s611_s12 = smov 128   ;;  %s612_s13 = smov 8  }
 0x252   :  { %345 = dma.vmem_to_hbm [thread:$0]  %s340_s28, 256, %s736_s5, [#allocation4], %s611_s12, %s611_s12, %s612_s13  }
 0x253   :  { %599 = dma.done.wait [#allocation4], 256  }
 0x254   :  { %600 = vsyncadd [#allocation4], 4294967040 }
 0x255   :  { %349 = vsyncpa [#allocation3], 1 }
 0x256   :  { %350 = vsyncpa [#allocation6], 1 }
 0x257   :  { %351 = vsyncpa [#allocation9], 1 }
 0x258   :  { %352 = vsyncpa [#allocation4], 1 }

</bundles_post_ra>
